<compile_context>
chip_gen: v7x
topology: tpu7x:2x2x1
jax: 0.10.0
libtpu: 0.0.40
codegen_flags: <defaults>
</compile_context>

<pallas_src>
import functools

import jax
import jax.numpy as jnp
import numpy as np
from jax.experimental import pallas as pl
from jax.experimental.pallas import tpu as pltpu

_EPS = 1e-5  # nn.BatchNorm1d default eps


def _basic_block_kernel(x_ref, mask_ref, w1_ref, w2_ref,
                        g1_ref, b1_ref, g2_ref, b2_ref, o_ref,
                        *, inv_count, matmul_dtype):
    """Fused BasicBlock forward on a lane-dense, channel-major slab.

    x_ref    : (C, Lp)         f32   padded-frame input slab (also the residual)
    mask_ref : (1, Lp)         f32   1.0 at valid output columns, 0.0 elsewhere
    w1_ref   : (3, Cout, Cin)  bf16  conv1 weight, tap-major
    w2_ref   : (3, Cout, Cout) bf16  conv2 weight, tap-major
    g*_ref   : (Cout, 1)       f32   BatchNorm gamma
    b*_ref   : (Cout, 1)       f32   BatchNorm beta
    o_ref    : (Cout, Lp)      f32   output slab (same padded-frame layout)
    """
    _, Lp = x_ref.shape
    Cout = w1_ref.shape[1]

    xs = x_ref[...]            # f32; reused (already aligned) as the residual
    mask = mask_ref[...]       # (1, Lp)

    def conv3(src, w_ref):
        # One (Cout, Cin) x (Cin, Lp) MXU matmul per tap; taps via lane rotation
        # (XLU).  f32 accumulation regardless of matmul operand dtype.
        acc = jnp.zeros((Cout, Lp), jnp.float32)
        for t in range(3):
            op = src if t == 1 else pltpu.roll(src, shift=(1 - t) % Lp, axis=1)
            acc = acc + jnp.dot(w_ref[t], op.astype(matmul_dtype),
                                preferred_element_type=jnp.float32)
        return acc

    def bn_train(z, g, b):
        # Fused single-pass masked batch statistics (biased variance, f32).
        zm = z * mask
        s = jnp.sum(zm, axis=1, keepdims=True)          # (Cout, 1)
        ss = jnp.sum(zm * z, axis=1, keepdims=True)     # (Cout, 1)
        mean = s * inv_count
        var = ss * inv_count - mean * mean
        return (z - mean) * jax.lax.rsqrt(var + _EPS) * g + b

    # conv1 -> bn1 -> relu ; mask re-zeroes the per-strip padding columns so
    # they act as conv2's zero padding (and kills garbage in padded lanes).
    c1 = conv3(xs, w1_ref)
    h = jnp.maximum(bn_train(c1, g1_ref[...], b1_ref[...]), 0.0) * mask

    # conv2 -> bn2 -> +identity -> relu
    c2 = conv3(h, w2_ref)
    y = bn_train(c2, g2_ref[...], b2_ref[...])
    o_ref[...] = jnp.maximum(y + xs, 0.0).astype(o_ref.dtype)


def basic_block_forward(x, params, *, matmul_dtype=jnp.bfloat16):
    """x: (N, C, L) float32. params from make_params(). Returns (N, C, L) f32."""
    N, C, L = x.shape
    Cout, Cin, K = params["w1"].shape
    assert K == 3 and Cin == C
    assert Cout == C, "residual path requires in_chanels == out_chanels (downsample=None)"

    strip = L + 2                       # per-sample strip incl. its own conv padding
    lflat = N * strip
    lpad = ((lflat + 127) // 128) * 128  # lane-dense width (multiple of 128)

    # ---- glue (plain XLA): pack x into the padded-frame, channel-major slab ----
    xt = jnp.transpose(x.astype(jnp.float32), (1, 0, 2))            # (C, N, L)
    x_slab = jnp.pad(xt, ((0, 0), (0, 0), (1, 1))).reshape(C, lflat)
    x_slab = jnp.pad(x_slab, ((0, 0), (0, lpad - lflat)))           # (C, lpad)

    # validity mask: 1.0 at real output columns, 0.0 at strip borders / lane pad
    cols = np.arange(lpad)
    pos = cols % strip
    mask_np = ((cols < lflat) & (pos >= 1) & (pos <= L)).astype(np.float32)
    mask = jnp.asarray(mask_np).reshape(1, lpad)

    # tap-major weights in the MXU operand dtype; 2-D lane-friendly BN params
    w1 = jnp.transpose(params["w1"], (2, 0, 1)).astype(matmul_dtype)  # (3, Cout, Cin)
    w2 = jnp.transpose(params["w2"], (2, 0, 1)).astype(matmul_dtype)  # (3, Cout, Cout)
    g1 = params["g1"].reshape(Cout, 1).astype(jnp.float32)
    b1 = params["b1"].reshape(Cout, 1).astype(jnp.float32)
    g2 = params["g2"].reshape(Cout, 1).astype(jnp.float32)
    b2 = params["b2"].reshape(Cout, 1).astype(jnp.float32)

    vmem = pl.BlockSpec(memory_space=pltpu.MemorySpace.VMEM)
    out_slab = pl.pallas_call(
        functools.partial(_basic_block_kernel,
                          inv_count=1.0 / float(N * L),
                          matmul_dtype=matmul_dtype),
        out_shape=jax.ShapeDtypeStruct((Cout, lpad), jnp.float32),
        in_specs=[vmem] * 8,
        out_specs=vmem,
        compiler_params=pltpu.CompilerParams(vmem_limit_bytes=32 * 1024 * 1024),
    )(x_slab, mask, w1, w2, g1, b1, g2, b2)

    # unpack: drop lane padding + per-strip border columns, back to (N, C, L)
    out = out_slab[:, :lflat].reshape(C, N, strip)[:, :, 1:L + 1]
    return jnp.transpose(out, (1, 0, 2))


# ----------------------------- pure-JAX reference -----------------------------
def _conv1d_ref(x, w):
    return jax.lax.conv_general_dilated(
        x, w, window_strides=(1,), padding=((1, 1),),
        dimension_numbers=("NCH", "OIH", "NCH"))


def _bn_train_ref(x, g, b):
    m = jnp.mean(x, axis=(0, 2), keepdims=True)
    v = jnp.mean((x - m) ** 2, axis=(0, 2), keepdims=True)
    return (x - m) * jax.lax.rsqrt(v + _EPS) * g.reshape(1, -1, 1) + b.reshape(1, -1, 1)


def basic_block_ref(x, p):
    out = _conv1d_ref(x, p["w1"])
    out = jnp.maximum(_bn_train_ref(out, p["g1"], p["b1"]), 0.0)
    out = _conv1d_ref(out, p["w2"])
    out = _bn_train_ref(out, p["g2"], p["b2"])
    return jnp.maximum(out + x, 0.0)


# ----------------------------- parameter init ---------------------------------
def make_params(key, in_ch, out_ch):
    k1, k2, k3, k4, k5, k6 = jax.random.split(key, 6)
    return {
        # Conv1d weights: (out_channels, in_channels, kernel_size=3), bias=False
        "w1": 0.3 * jax.random.normal(k1, (out_ch, in_ch, 3), jnp.float32),
        "w2": 0.3 * jax.random.normal(k2, (out_ch, out_ch, 3), jnp.float32),
        # BatchNorm1d affine params (deterministic, slightly off-identity)
        "g1": 1.0 + 0.1 * jax.random.normal(k3, (out_ch,), jnp.float32),
        "b1": 0.1 * jax.random.normal(k4, (out_ch,), jnp.float32),
        "g2": 1.0 + 0.1 * jax.random.normal(k5, (out_ch,), jnp.float32),
        "b2": 0.1 * jax.random.normal(k6, (out_ch,), jnp.float32),
    }


if __name__ == "__main__":
    key = jax.random.PRNGKey(0)
    kx, kp = jax.random.split(key)

    N, C, L = 2, 4, 16                      # small NCL input, Conv1d-style
    x = jax.random.normal(kx, (N, C, L), jnp.float32)
    params = make_params(kp, C, C)

    ref = jax.block_until_ready(basic_block_ref(x, params))

    # f32-MXU path: validates the kernel structure at tight tolerance.
    out_f32 = jax.block_until_ready(
        basic_block_forward(x, params, matmul_dtype=jnp.float32))
    np.testing.assert_allclose(np.asarray(out_f32), np.asarray(ref),
                               rtol=1e-4, atol=1e-4)

    # Default bf16-MXU path (per perf review): operands bf16, accumulation /
    # BN / residual in f32 -> looser tolerance reflects bf16 operand rounding.
    out_bf16 = jax.block_until_ready(basic_block_forward(x, params))
    np.testing.assert_allclose(np.asarray(out_bf16), np.asarray(ref),
                               rtol=5e-2, atol=5e-2)

    print("KERNEL_OK")
</pallas_src>

<mosaic_0001>
module attributes {stable_mosaic.version = 11 : i64} {
  func.func @_basic_block_kernel(%arg0: memref<4x128xf32, #tpu.memory_space<vmem>>, %arg1: memref<1x128xf32, #tpu.memory_space<vmem>>, %arg2: memref<3x4x4xf32, #tpu.memory_space<vmem>>, %arg3: memref<3x4x4xf32, #tpu.memory_space<vmem>>, %arg4: memref<4x1xf32, #tpu.memory_space<vmem>>, %arg5: memref<4x1xf32, #tpu.memory_space<vmem>>, %arg6: memref<4x1xf32, #tpu.memory_space<vmem>>, %arg7: memref<4x1xf32, #tpu.memory_space<vmem>>, %arg8: memref<4x128xf32, #tpu.memory_space<vmem>>) attributes {dimension_semantics = [], scalar_prefetch = 0 : i64, scratch_operands = 0 : i64, tpu.core_type = #tpu.core_type<tc>} {
    %c0 = arith.constant 0 : index
    %c0_0 = arith.constant 0 : index
    %0 = vector.load %arg0[%c0, %c0_0] : memref<4x128xf32, #tpu.memory_space<vmem>>, vector<4x128xf32>
    %c0_1 = arith.constant 0 : index
    %c0_2 = arith.constant 0 : index
    %1 = vector.load %arg1[%c0_1, %c0_2] : memref<1x128xf32, #tpu.memory_space<vmem>>, vector<1x128xf32>
    %cst = arith.constant 0.000000e+00 : f32
    %2 = vector.broadcast %cst : f32 to vector<4x128xf32>
    %c1_i32 = arith.constant 1 : i32
    %3 = tpu.dynamic_rotate %0 by %c1_i32 dim 1 : vector<4x128xf32>, i32 -> vector<4x128xf32>
    %c0_3 = arith.constant 0 : index
    %c0_4 = arith.constant 0 : index
    %c0_5 = arith.constant 0 : index
    %4 = vector.load %arg2[%c0_3, %c0_4, %c0_5] : memref<3x4x4xf32, #tpu.memory_space<vmem>>, vector<1x4x4xf32>
    %5 = vector.shape_cast %4 : vector<1x4x4xf32> to vector<4x4xf32>
    %cst_6 = arith.constant dense<0.000000e+00> : vector<4x128xf32>
    %6 = tpu.matmul %5, %3, %cst_6 {dimension_numbers = #tpu.dot_dimension_numbers<[1], [0], [0], [1], [0, 0, 1, 1], [], []>} : vector<4x4xf32>, vector<4x128xf32>, vector<4x128xf32> -> vector<4x128xf32>
    %7 = arith.addf %2, %6 : vector<4x128xf32>
    %c1 = arith.constant 1 : index
    %c0_7 = arith.constant 0 : index
    %c0_8 = arith.constant 0 : index
    %8 = vector.load %arg2[%c1, %c0_7, %c0_8] : memref<3x4x4xf32, #tpu.memory_space<vmem>>, vector<1x4x4xf32>
    %9 = vector.shape_cast %8 : vector<1x4x4xf32> to vector<4x4xf32>
    %cst_9 = arith.constant dense<0.000000e+00> : vector<4x128xf32>
    %10 = tpu.matmul %9, %0, %cst_9 {dimension_numbers = #tpu.dot_dimension_numbers<[1], [0], [0], [1], [0, 0, 1, 1], [], []>} : vector<4x4xf32>, vector<4x128xf32>, vector<4x128xf32> -> vector<4x128xf32>
    %11 = arith.addf %7, %10 : vector<4x128xf32>
    %c127_i32 = arith.constant 127 : i32
    %12 = tpu.dynamic_rotate %0 by %c127_i32 dim 1 : vector<4x128xf32>, i32 -> vector<4x128xf32>
    %c2 = arith.constant 2 : index
    %c0_10 = arith.constant 0 : index
    %c0_11 = arith.constant 0 : index
    %13 = vector.load %arg2[%c2, %c0_10, %c0_11] : memref<3x4x4xf32, #tpu.memory_space<vmem>>, vector<1x4x4xf32>
    %14 = vector.shape_cast %13 : vector<1x4x4xf32> to vector<4x4xf32>
    %cst_12 = arith.constant dense<0.000000e+00> : vector<4x128xf32>
    %15 = tpu.matmul %14, %12, %cst_12 {dimension_numbers = #tpu.dot_dimension_numbers<[1], [0], [0], [1], [0, 0, 1, 1], [], []>} : vector<4x4xf32>, vector<4x128xf32>, vector<4x128xf32> -> vector<4x128xf32>
    %16 = arith.addf %11, %15 : vector<4x128xf32>
    %c0_13 = arith.constant 0 : index
    %c0_14 = arith.constant 0 : index
    %17 = vector.load %arg4[%c0_13, %c0_14] : memref<4x1xf32, #tpu.memory_space<vmem>>, vector<4x1xf32>
    %c0_15 = arith.constant 0 : index
    %c0_16 = arith.constant 0 : index
    %18 = vector.load %arg5[%c0_15, %c0_16] : memref<4x1xf32, #tpu.memory_space<vmem>>, vector<4x1xf32>
    %19 = vector.broadcast %1 : vector<1x128xf32> to vector<4x128xf32>
    %20 = arith.mulf %16, %19 : vector<4x128xf32>
    %cst_17 = arith.constant dense<0.000000e+00> : vector<4xf32>
    %21 = vector.multi_reduction <add>, %20, %cst_17 [1] : vector<4x128xf32> to vector<4xf32>
    %22 = vector.shape_cast %21 : vector<4xf32> to vector<4x1xf32>
    %23 = arith.mulf %20, %16 : vector<4x128xf32>
    %cst_18 = arith.constant dense<0.000000e+00> : vector<4xf32>
    %24 = vector.multi_reduction <add>, %23, %cst_18 [1] : vector<4x128xf32> to vector<4xf32>
    %25 = vector.shape_cast %24 : vector<4xf32> to vector<4x1xf32>
    %cst_19 = arith.constant 3.125000e-02 : f32
    %26 = vector.broadcast %cst_19 : f32 to vector<4x1xf32>
    %27 = arith.mulf %22, %26 : vector<4x1xf32>
    %cst_20 = arith.constant 3.125000e-02 : f32
    %28 = vector.broadcast %cst_20 : f32 to vector<4x1xf32>
    %29 = arith.mulf %25, %28 : vector<4x1xf32>
    %30 = arith.mulf %27, %27 : vector<4x1xf32>
    %31 = arith.subf %29, %30 : vector<4x1xf32>
    %32 = vector.broadcast %27 : vector<4x1xf32> to vector<4x128xf32>
    %33 = arith.subf %16, %32 : vector<4x128xf32>
    %cst_21 = arith.constant 9.99999974E-6 : f32
    %34 = vector.broadcast %cst_21 : f32 to vector<4x1xf32>
    %35 = arith.addf %31, %34 : vector<4x1xf32>
    %36 = math.rsqrt %35 : vector<4x1xf32>
    %37 = vector.broadcast %36 : vector<4x1xf32> to vector<4x128xf32>
    %38 = arith.mulf %33, %37 : vector<4x128xf32>
    %39 = vector.broadcast %17 : vector<4x1xf32> to vector<4x128xf32>
    %40 = arith.mulf %38, %39 : vector<4x128xf32>
    %41 = vector.broadcast %18 : vector<4x1xf32> to vector<4x128xf32>
    %42 = arith.addf %40, %41 : vector<4x128xf32>
    %cst_22 = arith.constant 0.000000e+00 : f32
    %43 = vector.broadcast %cst_22 : f32 to vector<4x128xf32>
    %44 = arith.maximumf %42, %43 : vector<4x128xf32>
    %45 = vector.broadcast %1 : vector<1x128xf32> to vector<4x128xf32>
    %46 = arith.mulf %44, %45 : vector<4x128xf32>
    %cst_23 = arith.constant 0.000000e+00 : f32
    %47 = vector.broadcast %cst_23 : f32 to vector<4x128xf32>
    %c1_i32_24 = arith.constant 1 : i32
    %48 = tpu.dynamic_rotate %46 by %c1_i32_24 dim 1 : vector<4x128xf32>, i32 -> vector<4x128xf32>
    %c0_25 = arith.constant 0 : index
    %c0_26 = arith.constant 0 : index
    %c0_27 = arith.constant 0 : index
    %49 = vector.load %arg3[%c0_25, %c0_26, %c0_27] : memref<3x4x4xf32, #tpu.memory_space<vmem>>, vector<1x4x4xf32>
    %50 = vector.shape_cast %49 : vector<1x4x4xf32> to vector<4x4xf32>
    %cst_28 = arith.constant dense<0.000000e+00> : vector<4x128xf32>
    %51 = tpu.matmul %50, %48, %cst_28 {dimension_numbers = #tpu.dot_dimension_numbers<[1], [0], [0], [1], [0, 0, 1, 1], [], []>} : vector<4x4xf32>, vector<4x128xf32>, vector<4x128xf32> -> vector<4x128xf32>
    %52 = arith.addf %47, %51 : vector<4x128xf32>
    %c1_29 = arith.constant 1 : index
    %c0_30 = arith.constant 0 : index
    %c0_31 = arith.constant 0 : index
    %53 = vector.load %arg3[%c1_29, %c0_30, %c0_31] : memref<3x4x4xf32, #tpu.memory_space<vmem>>, vector<1x4x4xf32>
    %54 = vector.shape_cast %53 : vector<1x4x4xf32> to vector<4x4xf32>
    %cst_32 = arith.constant dense<0.000000e+00> : vector<4x128xf32>
    %55 = tpu.matmul %54, %46, %cst_32 {dimension_numbers = #tpu.dot_dimension_numbers<[1], [0], [0], [1], [0, 0, 1, 1], [], []>} : vector<4x4xf32>, vector<4x128xf32>, vector<4x128xf32> -> vector<4x128xf32>
    %56 = arith.addf %52, %55 : vector<4x128xf32>
    %c127_i32_33 = arith.constant 127 : i32
    %57 = tpu.dynamic_rotate %46 by %c127_i32_33 dim 1 : vector<4x128xf32>, i32 -> vector<4x128xf32>
    %c2_34 = arith.constant 2 : index
    %c0_35 = arith.constant 0 : index
    %c0_36 = arith.constant 0 : index
    %58 = vector.load %arg3[%c2_34, %c0_35, %c0_36] : memref<3x4x4xf32, #tpu.memory_space<vmem>>, vector<1x4x4xf32>
    %59 = vector.shape_cast %58 : vector<1x4x4xf32> to vector<4x4xf32>
    %cst_37 = arith.constant dense<0.000000e+00> : vector<4x128xf32>
    %60 = tpu.matmul %59, %57, %cst_37 {dimension_numbers = #tpu.dot_dimension_numbers<[1], [0], [0], [1], [0, 0, 1, 1], [], []>} : vector<4x4xf32>, vector<4x128xf32>, vector<4x128xf32> -> vector<4x128xf32>
    %61 = arith.addf %56, %60 : vector<4x128xf32>
    %c0_38 = arith.constant 0 : index
    %c0_39 = arith.constant 0 : index
    %62 = vector.load %arg6[%c0_38, %c0_39] : memref<4x1xf32, #tpu.memory_space<vmem>>, vector<4x1xf32>
    %c0_40 = arith.constant 0 : index
    %c0_41 = arith.constant 0 : index
    %63 = vector.load %arg7[%c0_40, %c0_41] : memref<4x1xf32, #tpu.memory_space<vmem>>, vector<4x1xf32>
    %64 = vector.broadcast %1 : vector<1x128xf32> to vector<4x128xf32>
    %65 = arith.mulf %61, %64 : vector<4x128xf32>
    %cst_42 = arith.constant dense<0.000000e+00> : vector<4xf32>
    %66 = vector.multi_reduction <add>, %65, %cst_42 [1] : vector<4x128xf32> to vector<4xf32>
    %67 = vector.shape_cast %66 : vector<4xf32> to vector<4x1xf32>
    %68 = arith.mulf %65, %61 : vector<4x128xf32>
    %cst_43 = arith.constant dense<0.000000e+00> : vector<4xf32>
    %69 = vector.multi_reduction <add>, %68, %cst_43 [1] : vector<4x128xf32> to vector<4xf32>
    %70 = vector.shape_cast %69 : vector<4xf32> to vector<4x1xf32>
    %cst_44 = arith.constant 3.125000e-02 : f32
    %71 = vector.broadcast %cst_44 : f32 to vector<4x1xf32>
    %72 = arith.mulf %67, %71 : vector<4x1xf32>
    %cst_45 = arith.constant 3.125000e-02 : f32
    %73 = vector.broadcast %cst_45 : f32 to vector<4x1xf32>
    %74 = arith.mulf %70, %73 : vector<4x1xf32>
    %75 = arith.mulf %72, %72 : vector<4x1xf32>
    %76 = arith.subf %74, %75 : vector<4x1xf32>
    %77 = vector.broadcast %72 : vector<4x1xf32> to vector<4x128xf32>
    %78 = arith.subf %61, %77 : vector<4x128xf32>
    %cst_46 = arith.constant 9.99999974E-6 : f32
    %79 = vector.broadcast %cst_46 : f32 to vector<4x1xf32>
    %80 = arith.addf %76, %79 : vector<4x1xf32>
    %81 = math.rsqrt %80 : vector<4x1xf32>
    %82 = vector.broadcast %81 : vector<4x1xf32> to vector<4x128xf32>
    %83 = arith.mulf %78, %82 : vector<4x128xf32>
    %84 = vector.broadcast %62 : vector<4x1xf32> to vector<4x128xf32>
    %85 = arith.mulf %83, %84 : vector<4x128xf32>
    %86 = vector.broadcast %63 : vector<4x1xf32> to vector<4x128xf32>
    %87 = arith.addf %85, %86 : vector<4x128xf32>
    %88 = arith.addf %87, %0 : vector<4x128xf32>
    %cst_47 = arith.constant 0.000000e+00 : f32
    %89 = vector.broadcast %cst_47 : f32 to vector<4x128xf32>
    %90 = arith.maximumf %88, %89 : vector<4x128xf32>
    %c0_48 = arith.constant 0 : index
    %c0_49 = arith.constant 0 : index
    %91 = vector.load %arg8[%c0_48, %c0_49] : memref<4x128xf32, #tpu.memory_space<vmem>>, vector<4x128xf32>
    tpu.vector_store %arg8[%c0_48, %c0_49], %90 {strides = array<i32>} : memref<4x128xf32, #tpu.memory_space<vmem>>, vector<4x128xf32>,
    return
  }
}

</mosaic_0001>

<bundles_post_ra>
// kernel: tpu_custom_call.1
= control target key start
LH: loop header
LB: loop body
LE: loop exit
PB: predicated region body
PF: predicated region fallthrough
CT: control target
= control target key end

     0   :  { %13 = vsyncpa [#allocation3], 0  ;;  %s889_s0 = inlined_call_operand.hbm [shape: f32[4,128], index: 0, kind: input, shape index: {}]   ;;  %s890_s1 = inlined_call_operand.vmem [shape: f32[1,128], index: 1, kind: input, shape index: {}]   ;;  %s891_s2 = inlined_call_operand.vmem [shape: f32[3,4,4], index: 2, kind: input, shape index: {}]   ;;  %s892_s3 = inlined_call_operand.vmem [shape: f32[3,4,4], index: 3, kind: input, shape index: {}]   ;;  %s893_s4 = inlined_call_operand.vmem [shape: f32[4,1], index: 4, kind: input, shape index: {}]   ;;  %s894_s5 = inlined_call_operand.vmem [shape: f32[4,1], index: 5, kind: input, shape index: {}]   ;;  %s895_s6 = inlined_call_operand.vmem [shape: f32[4,1], index: 6, kind: input, shape index: {}]   ;;  %s896_s7 = inlined_call_operand.vmem [shape: f32[4,1], index: 7, kind: input, shape index: {}]   ;;  %s897_s8 = inlined_call_operand.hbm [shape: f32[4,128], index: 8, kind: output, shape index: {}]  }
   0x1   :  { %14 = vsyncpa [#allocation4], 0  ;;  %s736_s27 = smov [#allocation2]   ;;  %s688_s9 = scalar_lea.hbm %s889_s0, 64 }
   0x2   :  { %s21_s28 = sshll.u32 %s736_s27, 4  ;;  %p689_p0 = scmp.ne.s32.totalorder %s889_s0, %s688_s9  ;;  %s22_s28 = int_to_ptr.vmem [resolvable:$true] %s21_s28 }
   0x3   :  { %p692_p1 = scmp.lt.u32.totalorder %s688_s9, %s889_s0 }
   0x5   :  { %p694_p2 = pnand %p692_p1, %p689_p0 }
   0x7   :  { %697 = shalt.err (!%p694_p2)
}
   0x8   :  { %s698_s14 = scalar_lea.vmem %s22_s28, 64  ;;  %p703_p4 = scmp.lt.s32.totalorder %s22_s28, %s22_s28 }
   0x9   :  { %p699_p3 = scmp.ne.s32.totalorder %s22_s28, %s698_s14  ;;  %p704_p5 = scmp.lt.s32.totalorder %s698_s14, %s698_s14 }
   0xb   :  { %p705_p6 = por %p704_p5, %p703_p4 }
   0xd   :  { %p706_p7 = pnand %p705_p6, %p699_p3 }
   0xf   :  { %709 = shalt.err (!%p706_p7)
}
  0x10   :  { %24 = dma.hbm_to_vmem [thread:$0]  %s889_s0, 64, %s22_s28, [#allocation3]  }
  0x11   :  { %732 = dma.done.wait [#allocation3], 64  }
  0x12   :  { %733 = vsyncadd [#allocation3], 4294967232  ;;  %v737_v0 = vmov 0.0   ;;  %vm738_vm0 = vmmov 0   ;;  %vm53_vm1 = vcmask 1043456   ;;  %vm49_vm2 = vcmask 31744  }
  0x13   :  { %637 = vmatprep.subr.mxu0 %v737_v0  ;;  %652 = vmatprep.subr.mxu1 %v737_v0  ;;  %v806_v1 = vld [vmem:[#allocation2] sm:$0xf]  ;;  %v608_v2 = vld [vmem:[%s891_s2 + $0x4] sm:$0xf]  ;;  %s739_s18 = smov 1   ;;  %s740_s19 = smov 127  }
  0x14   :  { %639 = vmatprep.mubr.msk.f32.mxu0 %vm738_vm0, %v737_v0  ;;  %654 = vmatprep.mubr.msk.f32.mxu1 %vm738_vm0, %v737_v0  ;;  %v46_v3 = vld [vmem:[%s891_s2] sm:$0xf]  ;;  %v613_v6 = vld [vmem:[%s891_s2 + $0x8] sm:$0xf]  ;;  %v741_v8 = vmov 0  }
  0x15   :  { %44 = vrot.lane.b32.xlu0 %v806_v1, %s739_s18  ;;  %638 = vmatpush3.msk.msra.mxu0 %vm53_vm1, %v806_v1  ;;  %v284_v7 = vld [vmem:[%s893_s4] sm:$0xf]  ;;  %v617_v33 = vld [vmem:[%s892_s3 + $0x4] sm:$0xf]  ;;  %v622_v37 = vld [vmem:[%s892_s3 + $0x8] sm:$0xf] }
  0x16   :  { %640 = vmatmul.mubr.msk.f32.vlgmr.msra.gmra.mrb[0].mxu0 %vm49_vm2, %v608_v2  ;;  %642 = vmatprep.subr.mxu0 %v737_v0  ;;  %v616_v9 = vld [vmem:[%s890_s1] ss:$0 sm:$0xff] }
  0x17   :  { %644 = vmatprep.mubr.msk.f32.mxu0 %vm738_vm0, %v737_v0  ;;  %682 = vset.pattern.permute.xlu0 %v741_v8  ;;  %v285_v16 = vld [vmem:[%s894_s5] sm:$0xf] }
  0x18   :  { %683 = vset.pattern.permute.xlu1 %v741_v8  ;;  %v324_v34 = vld [vmem:[%s892_s3] sm:$0xf]  ;;  %s742_s3 = smov [#allocation5]  }
  0x19   :  { %203 = vrot.lane.b32.xlu0 %v806_v1, %s740_s19  ;;  %v561_v44 = vld [vmem:[%s896_s7] sm:$0xf]  ;;  %s599_s7 = sshll.u32 %s742_s3, 4  ;;  %s600_s7 = int_to_ptr.vmem [resolvable:$true] %s599_s7 }
  0x1a   :  { %v560_v45 = vld [vmem:[%s895_s6] sm:$0xf]  ;;  %s710_s6 = scalar_lea.vmem %s600_s7, 64  ;;  %p715_p9 = scmp.lt.s32.totalorder %s600_s7, %s600_s7 }
  0x1b   :  { %p711_p8 = scmp.ne.s32.totalorder %s600_s7, %s710_s6  ;;  %p716_p10 = scmp.lt.s32.totalorder %s710_s6, %s710_s6 }
  0x1d   :  { %310 = vperm.xlu0 %682, %v284_v7   ;;  %p717_p11 = por %p716_p10, %p715_p9 }
  0x1f   :  { %p718_p12 = pnand %p717_p11, %p711_p8 }
  0x87   :  { %v45_v4 = vpop.permute.xlu0 %44 }
  0x88   :  { %643 = vmatpush3.msk.msra.mxu0 %vm53_vm1, %v45_v4 }
  0x89   :  { %645 = vmatmul.mubr.msk.f32.vlgmr.msra.gmra.mrb[0].mxu0 %vm49_vm2, %v46_v3  ;;  %647 = vmatprep.subr.mxu0 %v737_v0 }
  0x8a   :  { %649 = vmatprep.mubr.msk.f32.mxu0 %vm738_vm0, %v737_v0 }
  0x8b   :  { %v204_v5 = vpop.permute.xlu0 %203 }
  0x8c   :  { %648 = vmatpush3.msk.msra.mxu0 %vm53_vm1, %v204_v5 }
  0x91   :  { %650 = vmatmul.mubr.msk.f32.vlgmr.msra.gmra.mrb[0].mxu0 %vm49_vm2, %v613_v6 }
  0x9c   :  { %v311_v26 = vpop.permute.xlu0 %310 }
 0x164   :  { %v279_v10 = vpop.f32.mrb[0].mxu0 }
 0x165   :  { %v651_v11 = vpop.f32.mrb[1].mxu0  ;;  %v292_v12 = vmul.f32 %v616_v9, %v279_v10 }
 0x167   :  { %v293_v13 = vsel %vm53_vm1, %v292_v12, 0.0  ;;  %v296_v14 = vmul.f32 %v292_v12, %v279_v10 }
 0x168   :  { %294 = vadd.xlane.f32.xlu1 %v293_v13 }
 0x169   :  { %v297_v15 = vsel %vm53_vm1, %v296_v14, 0.0 }
 0x16c   :  { %298 = vadd.xlane.f32.xlu1 %v297_v15 }
 0x17d   :  { %316 = vperm.xlu1 %683, %v285_v16  }
 0x1f5   :  { %v295_v17 = vpop.xlane.xlu1 %294 }
 0x1f6   :  { %v300_v18 = vmul.f32 0.03125, %v295_v17 }
 0x1f8   :  { %v302_v20 = vmul.f32 %v300_v18, %v300_v18  ;;  %v304_v24 = vsub.f32 %v279_v10, %v300_v18 }
 0x1f9   :  { %v299_v19 = vpop.xlane.xlu1 %298 }
 0x1fa   :  { %v301_v21 = vmul.f32 0.03125, %v299_v19 }
 0x1fc   :  { %v303_v22 = vsub.f32 %v301_v21, %v302_v20 }
 0x1fd   :  { %v317_v28 = vpop.permute.xlu1 %316 }
 0x1fe   :  { %v305_v23 = vadd.f32 1e-05, %v303_v22 }
 0x200   :  { %684 = vrsqrt.f32 %v305_v23 }
 0x20a   :  { %v685_v25 = vpop.eup %684 }
 0x20b   :  { %v307_v27 = vmul.f32 %v685_v25, %v304_v24 }
 0x20d   :  { %v313_v29 = vmul.f32 %v311_v26, %v307_v27 }
 0x20f   :  { %v319_v30 = vadd.f32 %v317_v28, %v313_v29 }
 0x211   :  { %v320_v31 = vmax.f32 %v319_v30, 0.0 }
 0x213   :  { %v321_v32 = vmul.f32 %v616_v9, %v320_v31 }
 0x215   :  { %322 = vrot.lane.b32.xlu0 %v321_v32, %s739_s18  ;;  %653 = vmatpush3.msk.msra.mxu1 %vm53_vm1, %v321_v32 }
 0x216   :  { %655 = vmatmul.mubr.msk.f32.vlgmr.msra.gmra.mrb[0].mxu1 %vm49_vm2, %v617_v33  ;;  %657 = vmatprep.subr.mxu1 %v737_v0 }
 0x217   :  { %659 = vmatprep.mubr.msk.f32.mxu1 %vm738_vm0, %v737_v0 }
 0x219   :  { %479 = vrot.lane.b32.xlu0 %v321_v32, %s740_s19 }
 0x287   :  { %v323_v35 = vpop.permute.xlu0 %322 }
 0x288   :  { %658 = vmatpush3.msk.msra.mxu1 %vm53_vm1, %v323_v35 }
 0x289   :  { %660 = vmatmul.mubr.msk.f32.vlgmr.msra.gmra.mrb[0].mxu1 %vm49_vm2, %v324_v34  ;;  %662 = vmatprep.subr.mxu1 %v737_v0 }
 0x28a   :  { %664 = vmatprep.mubr.msk.f32.mxu1 %vm738_vm0, %v737_v0 }
 0x28b   :  { %v480_v36 = vpop.permute.xlu0 %479 }
 0x28c   :  { %663 = vmatpush3.msk.msra.mxu1 %vm53_vm1, %v480_v36 }
 0x291   :  { %665 = vmatmul.mubr.msk.f32.vlgmr.msra.gmra.mrb[0].mxu1 %vm49_vm2, %v622_v37 }
 0x364   :  { %v555_v38 = vpop.f32.mrb[0].mxu1 }
 0x365   :  { %v666_v39 = vpop.f32.mrb[1].mxu1  ;;  %v562_v40 = vmul.f32 %v616_v9, %v555_v38 }
 0x367   :  { %v563_v41 = vsel %vm53_vm1, %v562_v40, 0.0  ;;  %v566_v42 = vmul.f32 %v562_v40, %v555_v38 }
 0x368   :  { %564 = vadd.xlane.f32.xlu0 %v563_v41 }
 0x369   :  { %v567_v43 = vsel %vm53_vm1, %v566_v42, 0.0 }
 0x36a   :  { %568 = vadd.xlane.f32.xlu1 %v567_v43 }
 0x37b   :  { %586 = vperm.xlu1 %683, %v561_v44  }
 0x37e   :  { %580 = vperm.xlu0 %682, %v560_v45  }
 0x3f5   :  { %v565_v46 = vpop.xlane.xlu0 %564 }
 0x3f6   :  { %v570_v47 = vmul.f32 0.03125, %v565_v46 }
 0x3f7   :  { %v569_v48 = vpop.xlane.xlu1 %568 }
 0x3f8   :  { %v572_v49 = vmul.f32 %v570_v47, %v570_v47  ;;  %v571_v50 = vmul.f32 0.03125, %v569_v48  ;;  %v574_v53 = vsub.f32 %v555_v38, %v570_v47 }
 0x3fa   :  { %v573_v51 = vsub.f32 %v571_v50, %v572_v49 }
 0x3fb   :  { %v587_v58 = vpop.permute.xlu1 %586 }
 0x3fc   :  { %v575_v52 = vadd.f32 1e-05, %v573_v51 }
 0x3fd   :  { %v581_v56 = vpop.permute.xlu0 %580 }
 0x3fe   :  { %686 = vrsqrt.f32 %v575_v52 }
 0x408   :  { %v687_v54 = vpop.eup %686 }
 0x409   :  { %v577_v55 = vmul.f32 %v687_v54, %v574_v53 }
 0x40b   :  { %v583_v57 = vmul.f32 %v581_v56, %v577_v55 }
 0x40d   :  { %v589_v59 = vadd.f32 %v587_v58, %v583_v57 }
 0x40f   :  { %v590_v60 = vadd.f32 %v589_v59, %v806_v1 }
 0x411   :  { %v591_v61 = vmax.f32 %v590_v60, 0.0 }
 0x413   :  { %592 = vst [vmem:[#allocation5] sm:$0xf] %v591_v61 }
 0x414   :  { %721 = shalt.err (!%p718_p12)
}
 0x415   :  { %s722_s16 = scalar_lea.hbm %s897_s8, 64 }
 0x416   :  { %p723_p13 = scmp.ne.s32.totalorder %s897_s8, %s722_s16  ;;  %p726_p0 = scmp.lt.u32.totalorder %s722_s16, %s897_s8 }
 0x418   :  { %p728_p1 = pnand %p726_p0, %p723_p13 }
 0x41a   :  { %731 = shalt.err (!%p728_p1)
}
 0x41b   :  { %602 = dma.vmem_to_hbm [thread:$0]  %s600_s7, 64, %s897_s8, [#allocation4]  }
 0x41c   :  { %734 = dma.done.wait [#allocation4], 64  }
 0x41d   :  { %735 = vsyncadd [#allocation4], 4294967232 }
 0x41e   :  { %606 = vsyncpa [#allocation3], 1 }
 0x41f   :  { %607 = vsyncpa [#allocation4], 1 }

</bundles_post_ra>
